<compile_context>
chip_gen: v7x
topology: tpu7x:2x2x1
jax: 0.10.0
libtpu: 0.0.40
codegen_flags: <defaults>
</compile_context>

<pallas_src>
import math

import jax
import jax.numpy as jnp
from jax.experimental import pallas as pl
from jax.experimental.pallas import tpu as pltpu


def _cdiv(a, b):
    return -(-a // b)


def _round_up(x, m):
    return _cdiv(x, m) * m


def _balanced_tile(dim, max_tile, align):
    """Smallest aligned tile that covers `dim` in cdiv(dim, max_tile) blocks."""
    n_blocks = max(1, _cdiv(dim, max_tile))
    return _round_up(_cdiv(dim, n_blocks), align)


def _relu_linear_kernel(x_ref, w_ref, b_ref, o_ref, acc_ref):
    # x_ref: (tm, tk)  w_ref: (tk, tn)  b_ref: (1, tn)  o_ref: (tm, tn)
    # acc_ref: (tm, tn) f32 scratch, resident across the trailing K grid axis.
    k = pl.program_id(2)

    @pl.when(k == 0)
    def _():
        acc_ref[...] = jnp.zeros_like(acc_ref)

    acc_ref[...] += jnp.dot(
        x_ref[...], w_ref[...], preferred_element_type=jnp.float32
    )

    @pl.when(k == pl.num_programs(2) - 1)
    def _():
        # Fused epilogue: bias (broadcast over rows) + ReLU, then cast.
        o_ref[...] = jnp.maximum(acc_ref[...] + b_ref[...], 0.0).astype(o_ref.dtype)


def _cast_pad(a, dtype, pads):
    """Cast (if needed) and zero-pad (only if needed) in one wrapper pass."""
    if dtype is not None and a.dtype != dtype:
        a = a.astype(dtype)
    if any(p for _, p in pads):
        a = jnp.pad(a, pads)
    return a


def relu_layer(x, weight_t, bias, *, tile_m=1024, tile_n=256, tile_k=512,
               compute_dtype=None, max_batch_rows=2048):
    """Fused relu(x @ weight_t + bias).

    x:        (M, K)
    weight_t: (K, N)  -- transpose of the PyTorch (out, in) weight; may already
                         be stored in `compute_dtype` (recommended: pre-cast
                         once outside instead of per call).
    bias:     (N,)
    compute_dtype: optionally bf16 for the MXU inputs; accumulation stays f32
                   and the output keeps x.dtype.
    """
    M, K = x.shape
    Kw, N = weight_t.shape
    assert K == Kw
    assert bias.shape == (N,)
    out_dtype = x.dtype

    cdt = compute_dtype if compute_dtype is not None else x.dtype
    in_bytes = jnp.dtype(cdt).itemsize
    out_bytes = jnp.dtype(out_dtype).itemsize
    # Sublane alignment follows dtype packing: f32 -> 8, bf16 -> 16, 8-bit -> 32.
    align_m = {4: 8, 2: 16, 1: 32}.get(in_bytes, 8)

    # --- M tiling: single whole-batch block when modest, else balanced tiles. ---
    M_align = _round_up(M, align_m)
    if M_align <= max_batch_rows:
        tm = M_align               # weight streamed exactly once
    else:
        tm = _balanced_tile(M, tile_m, align_m)
    M_pad = _round_up(M, tm)
    m_blocks = M_pad // tm

    # --- N tiling (lane dim, 128-aligned); keep >=2 blocks for v7x's 2 TCs
    #     when the M grid has collapsed to a single block. ---
    tn = _balanced_tile(N, tile_n, 128)
    if m_blocks == 1 and _round_up(N, 128) >= 256 and _cdiv(_round_up(N, 128), tn) < 2:
        tn = _round_up(_cdiv(N, 2), 128)
    N_pad = _round_up(N, tn)

    # --- K tiling (reduction, 128-aligned, large by default). ---
    tk = _balanced_tile(K, tile_k, 128)
    K_pad = _round_up(K, tk)

    # Zero padding is exact: padded K columns contribute 0 to the dot product,
    # padded M rows / N columns are sliced off below. Padding is skipped when
    # shapes already align, and the cast is fused into the same wrapper pass.
    x_p = _cast_pad(x, compute_dtype, ((0, M_pad - M), (0, K_pad - K)))
    w_p = _cast_pad(weight_t, compute_dtype, ((0, K_pad - K), (0, N_pad - N)))
    b_p = _cast_pad(bias.astype(jnp.float32), None, ((0, N_pad - N),)).reshape(1, N_pad)

    grid = (M_pad // tm, N_pad // tn, K_pad // tk)

    # Explicit VMEM budget: double-buffered x/w/out tiles + f32 accumulator + bias.
    vmem_needed = (2 * (tm * tk + tk * tn) * in_bytes
                   + 2 * tm * tn * out_bytes
                   + tm * tn * 4
                   + 2 * tn * 4)
    vmem_limit = min(max(int(vmem_needed * 1.3) + (1 << 20), 32 << 20), 64 << 20)

    out = pl.pallas_call(
        _relu_linear_kernel,
        out_shape=jax.ShapeDtypeStruct((M_pad, N_pad), out_dtype),
        grid_spec=pltpu.PrefetchScalarGridSpec(
            num_scalar_prefetch=0,
            grid=grid,
            in_specs=[
                pl.BlockSpec((tm, tk), lambda i, j, k: (i, k)),
                pl.BlockSpec((tk, tn), lambda i, j, k: (k, j)),
                pl.BlockSpec((1, tn), lambda i, j, k: (0, j)),
            ],
            out_specs=pl.BlockSpec((tm, tn), lambda i, j, k: (i, j)),
            scratch_shapes=[pltpu.VMEM((tm, tn), jnp.float32)],
        ),
        compiler_params=pltpu.CompilerParams(
            # M / N blocks are independent (megacore-shardable on v7x);
            # K is the reduction axis and must run in order.
            dimension_semantics=("parallel", "parallel", "arbitrary"),
            vmem_limit_bytes=vmem_limit,
        ),
    )(x_p, w_p, b_p)

    if M_pad == M and N_pad == N:
        return out
    return out[:M, :N]


def init_relu_layer_params(key, in_features, out_features):
    """Deterministic params matching nn.Linear + xavier_normal_ on the weight."""
    kw, kb = jax.random.split(key)
    # xavier_normal_: std = sqrt(2 / (fan_in + fan_out))
    std = math.sqrt(2.0 / (in_features + out_features))
    weight = jax.random.normal(kw, (out_features, in_features), jnp.float32) * std
    # nn.Linear default bias init: U(-1/sqrt(fan_in), 1/sqrt(fan_in))
    bound = 1.0 / math.sqrt(in_features)
    bias = jax.random.uniform(
        kb, (out_features,), jnp.float32, minval=-bound, maxval=bound
    )
    return weight, bias


if __name__ == "__main__":
    key = jax.random.PRNGKey(0)
    k_x, k_p, k_x2, k_p2 = jax.random.split(key, 4)

    # Small shapes consistent with the module's Linear forward (f32, exact path).
    batch, in_features, out_features = 8, 32, 64
    x = jax.random.normal(k_x, (batch, in_features), jnp.float32)
    weight, bias = init_relu_layer_params(k_p, in_features, out_features)

    out = relu_layer(x, weight.T, bias)
    out = jax.block_until_ready(out)

    ref = jnp.maximum(x @ weight.T + bias, 0.0)
    assert out.shape == (batch, out_features)
    assert jnp.allclose(out, ref, atol=1e-5, rtol=1e-5)

    # Larger shape: whole-batch tm (weight streamed once), 2 N-blocks for the
    # v7x 2-TC case, K accumulation and padded tails (M=300, K=160, N=200).
    batch2, in2, out2 = 300, 160, 200
    x2 = jax.random.normal(k_x2, (batch2, in2), jnp.float32)
    w2, b2 = init_relu_layer_params(k_p2, in2, out2)
    ref_big = jnp.maximum(x2 @ w2.T + b2, 0.0)

    out_big = relu_layer(x2, w2.T, b2)
    out_big = jax.block_until_ready(out_big)
    assert jnp.allclose(out_big, ref_big, atol=1e-4, rtol=1e-4)

    # bf16 MXU-input path (f32 accumulation): weight pre-cast once outside the
    # call so the kernel sees it already in compute dtype (no per-call cast pass).
    w2_t_bf16 = w2.T.astype(jnp.bfloat16)
    out_bf16 = relu_layer(x2, w2_t_bf16, b2, compute_dtype=jnp.bfloat16)
    out_bf16 = jax.block_until_ready(out_bf16)
    assert out_bf16.dtype == x2.dtype
    assert jnp.allclose(out_bf16, ref_big, atol=5e-2, rtol=5e-2)

    print("KERNEL_OK")
</pallas_src>

<mosaic_0001>
module attributes {stable_mosaic.version = 11 : i64} {
  func.func @_relu_linear_kernel(%arg0: i32, %arg1: i32, %arg2: i32, %arg3: memref<8x128xf32, #tpu.memory_space<vmem>>, %arg4: memref<128x128xf32, #tpu.memory_space<vmem>>, %arg5: memref<1x128xf32, #tpu.memory_space<vmem>>, %arg6: memref<8x128xf32, #tpu.memory_space<vmem>>, %arg7: memref<8x128xf32, #tpu.memory_space<vmem>>) attributes {dimension_semantics = [#tpu.dimension_semantics<parallel>, #tpu.dimension_semantics<parallel>, #tpu.dimension_semantics<arbitrary>], iteration_bounds = array<i64: 1, 1, 1>, scalar_prefetch = 0 : i64, scratch_operands = 1 : i64, tpu.core_type = #tpu.core_type<tc>, window_params = [{transform_indices = @transform_0, window_bounds = array<i64: 8, 128>}, {transform_indices = @transform_1, window_bounds = array<i64: 128, 128>}, {transform_indices = @transform_2, window_bounds = array<i64: 1, 128>}, {transform_indices = @transform_3, window_bounds = array<i64: 8, 128>}]} {
    %c0_i32 = arith.constant 0 : i32
    %0 = arith.cmpi eq, %arg2, %c0_i32 : i32
    %1 = arith.extui %0 : i1 to i32
    %c0_i32_0 = arith.constant 0 : i32
    %2 = arith.cmpi ne, %1, %c0_i32_0 : i32
    scf.if %2 {
      %cst_10 = arith.constant 0.000000e+00 : f32
      %12 = vector.broadcast %cst_10 : f32 to vector<8x128xf32>
      %c0_11 = arith.constant 0 : index
      %c0_12 = arith.constant 0 : index
      %13 = vector.load %arg7[%c0_11, %c0_12] : memref<8x128xf32, #tpu.memory_space<vmem>>, vector<8x128xf32>
      tpu.vector_store %arg7[%c0_11, %c0_12], %12 {strides = array<i32>} : memref<8x128xf32, #tpu.memory_space<vmem>>, vector<8x128xf32>,
    } else {
    }
    %c0 = arith.constant 0 : index
    %c0_1 = arith.constant 0 : index
    %3 = vector.load %arg7[%c0, %c0_1] : memref<8x128xf32, #tpu.memory_space<vmem>>, vector<8x128xf32>
    %c0_2 = arith.constant 0 : index
    %c0_3 = arith.constant 0 : index
    %4 = vector.load %arg3[%c0_2, %c0_3] : memref<8x128xf32, #tpu.memory_space<vmem>>, vector<8x128xf32>
    %c0_4 = arith.constant 0 : index
    %c0_5 = arith.constant 0 : index
    %5 = vector.load %arg4[%c0_4, %c0_5] : memref<128x128xf32, #tpu.memory_space<vmem>>, vector<128x128xf32>
    %cst = arith.constant dense<0.000000e+00> : vector<8x128xf32>
    %6 = tpu.matmul %4, %5, %cst {dimension_numbers = #tpu.dot_dimension_numbers<[1], [0], [0], [1], [0, 0, 1, 1], [], []>} : vector<8x128xf32>, vector<128x128xf32>, vector<8x128xf32> -> vector<8x128xf32>
    %7 = arith.addf %3, %6 : vector<8x128xf32>
    %c0_6 = arith.constant 0 : index
    %c0_7 = arith.constant 0 : index
    %8 = vector.load %arg7[%c0_6, %c0_7] : memref<8x128xf32, #tpu.memory_space<vmem>>, vector<8x128xf32>
    tpu.vector_store %arg7[%c0_6, %c0_7], %7 {strides = array<i32>} : memref<8x128xf32, #tpu.memory_space<vmem>>, vector<8x128xf32>,
    %c0_i32_8 = arith.constant 0 : i32
    %9 = arith.cmpi eq, %arg2, %c0_i32_8 : i32
    %10 = arith.extui %9 : i1 to i32
    %c0_i32_9 = arith.constant 0 : i32
    %11 = arith.cmpi ne, %10, %c0_i32_9 : i32
    scf.if %11 {
      %c0_10 = arith.constant 0 : index
      %c0_11 = arith.constant 0 : index
      %12 = vector.load %arg7[%c0_10, %c0_11] : memref<8x128xf32, #tpu.memory_space<vmem>>, vector<8x128xf32>
      %c0_12 = arith.constant 0 : index
      %c0_13 = arith.constant 0 : index
      %13 = vector.load %arg5[%c0_12, %c0_13] : memref<1x128xf32, #tpu.memory_space<vmem>>, vector<1x128xf32>
      %14 = vector.broadcast %13 : vector<1x128xf32> to vector<8x128xf32>
      %15 = arith.addf %12, %14 : vector<8x128xf32>
      %cst_14 = arith.constant 0.000000e+00 : f32
      %16 = vector.broadcast %cst_14 : f32 to vector<8x128xf32>
      %17 = arith.maximumf %15, %16 : vector<8x128xf32>
      %c0_15 = arith.constant 0 : index
      %c0_16 = arith.constant 0 : index
      %18 = vector.load %arg6[%c0_15, %c0_16] : memref<8x128xf32, #tpu.memory_space<vmem>>, vector<8x128xf32>
      tpu.vector_store %arg6[%c0_15, %c0_16], %17 {strides = array<i32>} : memref<8x128xf32, #tpu.memory_space<vmem>>, vector<8x128xf32>,
    } else {
    }
    return
  }
  func.func @transform_0(%arg0: i32, %arg1: i32, %arg2: i32) -> (i32, i32) {
    %c0_i32 = arith.constant 0 : i32
    return %arg0, %arg2 : i32, i32
  }
  func.func @transform_1(%arg0: i32, %arg1: i32, %arg2: i32) -> (i32, i32) {
    %c0_i32 = arith.constant 0 : i32
    return %arg2, %arg1 : i32, i32
  }
  func.func @transform_2(%arg0: i32, %arg1: i32, %arg2: i32) -> (i32, i32) {
    %c0_i32 = arith.constant 0 : i32
    %c0_i32_0 = arith.constant 0 : i32
    return %c0_i32, %arg1 : i32, i32
  }
  func.func @transform_3(%arg0: i32, %arg1: i32, %arg2: i32) -> (i32, i32) {
    %c0_i32 = arith.constant 0 : i32
    return %arg0, %arg1 : i32, i32
  }
}

</mosaic_0001>

<bundles_post_ra>
// kernel: tpu_custom_call.1
= control target key start
LH: loop header
LB: loop body
LE: loop exit
PB: predicated region body
PF: predicated region fallthrough
CT: control target
= control target key end

     0   :  { %8 = vsyncpa [#allocation4], 0  ;;  %s397_s0 = inlined_call_operand.hbm [shape: f32[8,128], index: 0, kind: input, shape index: {}]   ;;  %s398_s1 = inlined_call_operand.hbm [shape: f32[128,128], index: 1, kind: input, shape index: {}]   ;;  %s399_s2 = inlined_call_operand.vmem [shape: f32[1,128], index: 2, kind: input, shape index: {}]   ;;  %s400_s3 = inlined_call_operand.hbm [shape: f32[8,128], index: 3, kind: output, shape index: {}]  }
   0x1   :  { %9 = vsyncpa [#allocation7], 0 }
   0x2   :  { %10 = vsyncpa [#allocation5], 0  ;;  %s323_s12 = smov [#allocation3]   ;;  %s324_s14 = smov [#allocation6]  }
   0x3   :  { %s17_s13 = sshll.u32 %s323_s12, 4  ;;  %s26_s15 = sshll.u32 %s324_s14, 4  ;;  %s18_s13 = int_to_ptr.vmem [resolvable:$true] %s17_s13  ;;  %s351_s15 = int_to_ptr.vmem [resolvable:$true] %s26_s15 }
   0x4   :  { %s251_s18 = scalar_lea.hbm %s397_s0, 128 }
   0x5   :  { %p252_p0 = scmp.ne.s32.totalorder %s397_s0, %s251_s18  ;;  %p255_p1 = scmp.lt.u32.totalorder %s251_s18, %s397_s0 }
   0x7   :  { %p257_p2 = pnand %p255_p1, %p252_p0 }
   0x9   :  { %260 = shalt.err (!%p257_p2)
}
   0xa   :  { %s261_s23 = scalar_lea.vmem %s18_s13, 128  ;;  %p266_p4 = scmp.lt.s32.totalorder %s18_s13, %s18_s13 }
   0xb   :  { %p262_p3 = scmp.ne.s32.totalorder %s18_s13, %s261_s23  ;;  %p267_p5 = scmp.lt.s32.totalorder %s261_s23, %s261_s23 }
   0xd   :  { %p268_p6 = por %p267_p5, %p266_p4 }
   0xf   :  { %p269_p7 = pnand %p268_p6, %p262_p3 }
  0x11   :  { %272 = shalt.err (!%p269_p7)
}
  0x12   :  { %20 = dma.hbm_to_vmem [thread:$0]  %s397_s0, 128, %s18_s13, [#allocation4]  }
  0x13   :  { %s273_s28 = scalar_lea.hbm %s398_s1, 2048 }
  0x14   :  { %p274_p8 = scmp.ne.s32.totalorder %s398_s1, %s273_s28  ;;  %p277_p9 = scmp.lt.u32.totalorder %s273_s28, %s398_s1 }
  0x16   :  { %p279_p10 = pnand %p277_p9, %p274_p8 }
  0x18   :  { %282 = shalt.err (!%p279_p10)
}
  0x19   :  { %s283_s6 = scalar_lea.vmem %s351_s15, 2048  ;;  %p288_p12 = scmp.lt.s32.totalorder %s351_s15, %s351_s15 }
  0x1a   :  { %p284_p11 = scmp.ne.s32.totalorder %s351_s15, %s283_s6  ;;  %p289_p13 = scmp.lt.s32.totalorder %s283_s6, %s283_s6 }
  0x1c   :  { %p290_p0 = por %p289_p13, %p288_p12 }
  0x1e   :  { %p291_p1 = pnand %p290_p0, %p284_p11 }
  0x20   :  { %294 = shalt.err (!%p291_p1)
}
  0x21   :  { %s325_s0 = smov 128   ;;  %s326_s7 = smov 8  }
  0x22   :  { %32 = dma.hbm_to_vmem [thread:$0]  %s398_s1, 2048, %s351_s15, [#allocation7], %s325_s0, %s325_s0, %s326_s7  }
  0x23   :  { %317 = dma.done.wait [#allocation4], 128  }
  0x24   :  { %318 = vsyncadd [#allocation4], 4294967168 }
  0x25   :  { %319 = dma.done.wait [#allocation7], 2048  }
  0x26   :  { %320 = vsyncadd [#allocation7], 4294965248  ;;  %v327_v0 = vmov 0.0|0.0   ;;  %vm328_vm0 = vmmov 0   ;;  %v329_v1 = vmov 0.0   ;;  %v48_v2 = vld [vmem:[#allocation6] sm:$0xff] }
  0x27   :  { %219 = vmatprep.subr.bf16.mxu0 %v327_v0  ;;  %216 = vmatprep.mubr.msk.f32.mxu0 %vm328_vm0, %v329_v1  ;;  %v49_v3 = vld [vmem:[#allocation6 + $0x8] sm:$0xff]  ;;  %v50_v4 = vld [vmem:[#allocation6 + $0x10] sm:$0xff]  ;;  %v51_v6 = vld [vmem:[#allocation6 + $0x18] sm:$0xff]  ;;  %s330_s11 = smov [#allocation8]  }
  0x28   :  { %v220_v5 = vpack.c.bf16 %v49_v3, %v48_v2  ;;  %v223_v7 = vpack.c.bf16 %v51_v6, %v50_v4  ;;  %v52_v8 = vld [vmem:[#allocation6 + $0x20] sm:$0xff]  ;;  %v53_v9 = vld [vmem:[#allocation6 + $0x28] sm:$0xff]  ;;  %v54_v11 = vld [vmem:[#allocation6 + $0x30] sm:$0xff]  ;;  %s156_s12 = sshll.u32 %s330_s11, 4  ;;  %s157_s12 = int_to_ptr.vmem [resolvable:$true] %s156_s12 }
  0x29   :  { %v226_v10 = vpack.c.bf16 %v53_v9, %v52_v8  ;;  %v55_v12 = vld [vmem:[#allocation6 + $0x38] sm:$0xff]  ;;  %v56_v14 = vld [vmem:[#allocation6 + $0x40] sm:$0xff]  ;;  %v57_v15 = vld [vmem:[#allocation6 + $0x48] sm:$0xff]  ;;  %s295_s13 = scalar_lea.vmem %s157_s12, 128  ;;  %p300_p3 = scmp.lt.s32.totalorder %s157_s12, %s157_s12 }
  0x2a   :  { %221 = vmatpush3.bf16.msra.mxu0 %v220_v5  ;;  %v229_v13 = vpack.c.bf16 %v55_v12, %v54_v11  ;;  %v232_v16 = vpack.c.bf16 %v57_v15, %v56_v14  ;;  %v58_v17 = vld [vmem:[#allocation6 + $0x50] sm:$0xff]  ;;  %v59_v18 = vld [vmem:[#allocation6 + $0x58] sm:$0xff]  ;;  %v60_v20 = vld [vmem:[#allocation6 + $0x60] sm:$0xff]  ;;  %p296_p2 = scmp.ne.s32.totalorder %s157_s12, %s295_s13  ;;  %p301_p4 = scmp.lt.s32.totalorder %s295_s13, %s295_s13 }
  0x2b   :  { %222 = vmatprep.subr.bf16.mxu0 %v327_v0  ;;  %v235_v19 = vpack.c.bf16 %v59_v18, %v58_v17  ;;  %v61_v21 = vld [vmem:[#allocation6 + $0x68] sm:$0xff]  ;;  %v62_v23 = vld [vmem:[#allocation6 + $0x70] sm:$0xff]  ;;  %v63_v24 = vld [vmem:[#allocation6 + $0x78] sm:$0xff] }
  0x2c   :  { %v238_v22 = vpack.c.bf16 %v61_v21, %v60_v20  ;;  %v241_v25 = vpack.c.bf16 %v63_v24, %v62_v23  ;;  %v47_v26 = vld [vmem:[#allocation3] sm:$0xff]  ;;  %p302_p5 = por %p301_p4, %p300_p3 }
  0x2d   :  { %v166_v27 = vld [vmem:[%s399_s2] ss:$0 sm:$0xff] }
  0x2e   :  { %224 = vmatpush3.bf16.msra.mxu0 %v223_v7  ;;  %p303_p6 = pnand %p302_p5, %p296_p2 }
  0x2f   :  { %225 = vmatprep.subr.bf16.mxu0 %v327_v0 }
  0x32   :  { %227 = vmatpush3.bf16.msra.mxu0 %v226_v10 }
  0x33   :  { %228 = vmatprep.subr.bf16.mxu0 %v327_v0 }
  0x36   :  { %230 = vmatpush3.bf16.msra.mxu0 %v229_v13 }
  0x37   :  { %231 = vmatprep.subr.bf16.mxu0 %v327_v0 }
  0x3a   :  { %233 = vmatpush3.bf16.msra.mxu0 %v232_v16 }
  0x3b   :  { %234 = vmatprep.subr.bf16.mxu0 %v327_v0 }
  0x3e   :  { %236 = vmatpush3.bf16.msra.mxu0 %v235_v19 }
  0x3f   :  { %237 = vmatprep.subr.bf16.mxu0 %v327_v0 }
  0x42   :  { %239 = vmatpush3.bf16.msra.mxu0 %v238_v22 }
  0x43   :  { %240 = vmatprep.subr.bf16.mxu0 %v327_v0 }
  0x46   :  { %242 = vmatpush3.bf16.msra.mxu0 %v241_v25 }
  0x49   :  { %217 = vmatmul.mubr.f32.vlgmr.msra.gmra.mrb[0].mxu0 %v47_v26 }
 0x11c   :  { %v130_v28 = vpop.f32.mrb[0].mxu0 }
 0x11d   :  { %v147_v29 = vadd.f32 %v166_v27, %v130_v28  ;;  %v218_v30 = vpop.f32.mrb[1].mxu0 }
 0x11f   :  { %v148_v31 = vmax.f32 %v147_v29, 0.0 }
 0x121   :  { %149 = vst [vmem:[#allocation8] sm:$0xff] %v148_v31 }
 0x122   :  { %306 = shalt.err (!%p303_p6)
}
 0x123   :  { %s307_s16 = scalar_lea.hbm %s400_s3, 128 }
 0x124   :  { %p308_p7 = scmp.ne.s32.totalorder %s400_s3, %s307_s16  ;;  %p311_p8 = scmp.lt.u32.totalorder %s307_s16, %s400_s3 }
 0x126   :  { %p313_p9 = pnand %p311_p8, %p308_p7 }
 0x128   :  { %316 = shalt.err (!%p313_p9)
}
 0x129   :  { %159 = dma.vmem_to_hbm [thread:$0]  %s157_s12, 128, %s400_s3, [#allocation5]  }
 0x12a   :  { %321 = dma.done.wait [#allocation5], 128  }
 0x12b   :  { %322 = vsyncadd [#allocation5], 4294967168 }
 0x12c   :  { %163 = vsyncpa [#allocation4], 1 }
 0x12d   :  { %164 = vsyncpa [#allocation7], 1 }
 0x12e   :  { %165 = vsyncpa [#allocation5], 1 }

</bundles_post_ra>
